<compile_context>
chip_gen: v7x
topology: tpu7x:2x2x1
jax: 0.10.0
libtpu: 0.0.40
codegen_flags: <defaults>
</compile_context>

<pallas_src>
import functools

import jax
import jax.numpy as jnp
from jax.experimental import pallas as pl
from jax.experimental.pallas import tpu as pltpu

HIDDEN = 256
HEAD_PAD = 128          # lane-padded width of each head inside the fused head weight
LOG_STD_MIN = -20.0
LOG_STD_MAX = 2.0
EDGE = 0.003


def _policy_kernel(x_ref, w1_ref, b1_ref, w2_ref, b2_ref, wh_ref, bh_ref,
                   mean_ref, logstd_ref):
    a_dim = mean_ref.shape[-1]

    x = x_ref[...].astype(jnp.bfloat16)

    # linear1 + ReLU  (bf16 x bf16 -> f32 accumulate on the MXU)
    h1 = jnp.dot(x, w1_ref[...], preferred_element_type=jnp.float32) + b1_ref[...]
    h1 = jnp.maximum(h1, 0.0).astype(jnp.bfloat16)

    # linear2 + ReLU
    h2 = jnp.dot(h1, w2_ref[...], preferred_element_type=jnp.float32) + b2_ref[...]
    h2 = jnp.maximum(h2, 0.0).astype(jnp.bfloat16)

    # Fused mean|log_std head: one 256-wide matmul instead of two 128-wide ones.
    heads = jnp.dot(h2, wh_ref[...], preferred_element_type=jnp.float32) + bh_ref[...]

    mean_ref[...] = heads[:, :a_dim]
    logstd_ref[...] = jnp.clip(heads[:, HEAD_PAD:HEAD_PAD + a_dim],
                               LOG_STD_MIN, LOG_STD_MAX)


@functools.partial(jax.jit, static_argnames=("action_dim",))
def policy_net_forward(state, params, *, action_dim):
    """PolicyNet.forward. state: (B, S) f32. Returns (mean, log_std), each (B, A) f32."""
    B, S = state.shape
    A = action_dim

    # Batch tile: full batch if small (full-array exception to the (8,128) rule),
    # otherwise 256-row tiles (fills the v6e/v7x MXU M dim; 2x128 tiles on v5e).
    TB = B if B <= 256 else 256
    n_blocks = pl.cdiv(B, TB)

    const = lambda shape: pl.BlockSpec(shape, lambda i: (0,) * len(shape))

    mean, log_std = pl.pallas_call(
        _policy_kernel,
        out_shape=(
            jax.ShapeDtypeStruct((B, A), jnp.float32),
            jax.ShapeDtypeStruct((B, A), jnp.float32),
        ),
        grid=(n_blocks,),
        in_specs=[
            pl.BlockSpec((TB, S), lambda i: (i, 0)),   # state tile (double-buffered)
            const(params["w1"].shape),                 # weights: constant index map
            const(params["b1"].shape),                 #   -> VMEM-resident across grid
            const(params["w2"].shape),
            const(params["b2"].shape),
            const(params["wh"].shape),
            const(params["bh"].shape),
        ],
        out_specs=(
            pl.BlockSpec((TB, A), lambda i: (i, 0)),
            pl.BlockSpec((TB, A), lambda i: (i, 0)),
        ),
        compiler_params=pltpu.CompilerParams(
            dimension_semantics=("parallel",)),
    )(state, params["w1"], params["b1"], params["w2"], params["b2"],
      params["wh"], params["bh"])

    return mean, log_std


def init_policy_params(key, state_dim, action_dim, edge=EDGE):
    """Raw f32 parameters mirroring the PyTorch module's shapes / init scheme.

    Weights are stored transposed vs. PyTorch, i.e. (in_features, out_features)."""
    k1, k2, k3, k4, k5, k6, k7, k8 = jax.random.split(key, 8)
    lim1 = 1.0 / float(state_dim) ** 0.5
    lim2 = 1.0 / float(HIDDEN) ** 0.5
    return {
        "w1": jax.random.uniform(k1, (state_dim, HIDDEN), jnp.float32, -lim1, lim1),
        "b1": jax.random.uniform(k2, (HIDDEN,), jnp.float32, -lim1, lim1),
        "w2": jax.random.uniform(k3, (HIDDEN, HIDDEN), jnp.float32, -lim2, lim2),
        "b2": jax.random.uniform(k4, (HIDDEN,), jnp.float32, -lim2, lim2),
        "wm": jax.random.uniform(k5, (HIDDEN, action_dim), jnp.float32, -edge, edge),
        "bm": jax.random.uniform(k6, (action_dim,), jnp.float32, -edge, edge),
        "ws": jax.random.uniform(k7, (HIDDEN, action_dim), jnp.float32, -edge, edge),
        "bs": jax.random.uniform(k8, (action_dim,), jnp.float32, -edge, edge),
    }


def pack_policy_params(raw):
    """One-time packing for the kernel: bf16 weights, (1, N) f32 bias rows, and the
    two heads fused into a single lane-padded (HIDDEN, 2*HEAD_PAD) weight."""
    A = raw["wm"].shape[1]
    wh = jnp.zeros((HIDDEN, 2 * HEAD_PAD), jnp.float32)
    wh = wh.at[:, :A].set(raw["wm"]).at[:, HEAD_PAD:HEAD_PAD + A].set(raw["ws"])
    bh = jnp.zeros((1, 2 * HEAD_PAD), jnp.float32)
    bh = bh.at[0, :A].set(raw["bm"]).at[0, HEAD_PAD:HEAD_PAD + A].set(raw["bs"])
    return {
        "w1": raw["w1"].astype(jnp.bfloat16),
        "b1": raw["b1"].reshape(1, HIDDEN),
        "w2": raw["w2"].astype(jnp.bfloat16),
        "b2": raw["b2"].reshape(1, HIDDEN),
        "wh": wh.astype(jnp.bfloat16),
        "bh": bh,
    }


def _reference_forward(state, p):
    h1 = jnp.maximum(state @ p["w1"] + p["b1"], 0.0)
    h2 = jnp.maximum(h1 @ p["w2"] + p["b2"], 0.0)
    mean = h2 @ p["wm"] + p["bm"]
    log_std = jnp.clip(h2 @ p["ws"] + p["bs"], LOG_STD_MIN, LOG_STD_MAX)
    return mean, log_std


if __name__ == "__main__":
    key = jax.random.PRNGKey(0)
    k_param, k_small, k_big = jax.random.split(key, 3)

    state_dim, action_dim = 16, 4
    raw = init_policy_params(k_param, state_dim, action_dim)
    params = pack_policy_params(raw)   # packed once; reused by every forward call

    # Small batch (B=2): single block, full-array BlockSpecs.
    state = jax.random.normal(k_small, (2, state_dim), jnp.float32)
    mean, log_std = policy_net_forward(state, params, action_dim=action_dim)
    jax.block_until_ready((mean, log_std))

    ref_mean, ref_log_std = _reference_forward(state, raw)
    assert mean.shape == (2, action_dim)
    assert log_std.shape == (2, action_dim)
    # bf16 matmuls vs f32 reference -> relaxed tolerance.
    assert jnp.allclose(mean, ref_mean, atol=1e-2, rtol=1e-2)
    assert jnp.allclose(log_std, ref_log_std, atol=1e-2, rtol=1e-2)

    # Larger batch (B=512): exercises the batch grid / pipelined state tiles.
    state_big = jax.random.normal(k_big, (512, state_dim), jnp.float32)
    mean_b, log_std_b = policy_net_forward(state_big, params, action_dim=action_dim)
    jax.block_until_ready((mean_b, log_std_b))
    ref_mean_b, ref_log_std_b = _reference_forward(state_big, raw)
    assert jnp.allclose(mean_b, ref_mean_b, atol=1e-2, rtol=1e-2)
    assert jnp.allclose(log_std_b, ref_log_std_b, atol=1e-2, rtol=1e-2)

    print("KERNEL_OK")
</pallas_src>

<mosaic_0001>
module attributes {stable_mosaic.version = 11 : i64} {
  func.func @_policy_kernel(%arg0: i32, %arg1: memref<2x16xf32, #tpu.memory_space<vmem>>, %arg2: memref<16x256xbf16, #tpu.memory_space<vmem>>, %arg3: memref<1x256xf32, #tpu.memory_space<vmem>>, %arg4: memref<256x256xbf16, #tpu.memory_space<vmem>>, %arg5: memref<1x256xf32, #tpu.memory_space<vmem>>, %arg6: memref<256x256xbf16, #tpu.memory_space<vmem>>, %arg7: memref<1x256xf32, #tpu.memory_space<vmem>>, %arg8: memref<2x4xf32, #tpu.memory_space<vmem>>, %arg9: memref<2x4xf32, #tpu.memory_space<vmem>>) attributes {dimension_semantics = [#tpu.dimension_semantics<parallel>], iteration_bounds = array<i64: 1>, scalar_prefetch = 0 : i64, scratch_operands = 0 : i64, tpu.core_type = #tpu.core_type<tc>, window_params = [{transform_indices = @transform_0, window_bounds = array<i64: 2, 16>}, {pipeline_mode = #tpu.pipeline_mode<synchronous>, transform_indices = @transform_1, window_bounds = array<i64: 16, 256>}, {pipeline_mode = #tpu.pipeline_mode<synchronous>, transform_indices = @transform_2, window_bounds = array<i64: 1, 256>}, {pipeline_mode = #tpu.pipeline_mode<synchronous>, transform_indices = @transform_3, window_bounds = array<i64: 256, 256>}, {pipeline_mode = #tpu.pipeline_mode<synchronous>, transform_indices = @transform_4, window_bounds = array<i64: 1, 256>}, {pipeline_mode = #tpu.pipeline_mode<synchronous>, transform_indices = @transform_5, window_bounds = array<i64: 256, 256>}, {pipeline_mode = #tpu.pipeline_mode<synchronous>, transform_indices = @transform_6, window_bounds = array<i64: 1, 256>}, {transform_indices = @transform_7, window_bounds = array<i64: 2, 4>}, {transform_indices = @transform_8, window_bounds = array<i64: 2, 4>}]} {
    %c0 = arith.constant 0 : index
    %c0_0 = arith.constant 0 : index
    %0 = vector.load %arg1[%c0, %c0_0] : memref<2x16xf32, #tpu.memory_space<vmem>>, vector<2x16xf32>
    %1 = arith.truncf %0 : vector<2x16xf32> to vector<2x16xbf16>
    %c0_1 = arith.constant 0 : index
    %c0_2 = arith.constant 0 : index
    %2 = vector.load %arg2[%c0_1, %c0_2] : memref<16x256xbf16, #tpu.memory_space<vmem>>, vector<16x256xbf16>
    %cst = arith.constant dense<0.000000e+00> : vector<2x256xf32>
    %3 = tpu.matmul %1, %2, %cst {dimension_numbers = #tpu.dot_dimension_numbers<[1], [0], [0], [1], [0, 0, 1, 1], [], []>} : vector<2x16xbf16>, vector<16x256xbf16>, vector<2x256xf32> -> vector<2x256xf32>
    %c0_3 = arith.constant 0 : index
    %c0_4 = arith.constant 0 : index
    %4 = vector.load %arg3[%c0_3, %c0_4] : memref<1x256xf32, #tpu.memory_space<vmem>>, vector<1x256xf32>
    %5 = vector.broadcast %4 : vector<1x256xf32> to vector<2x256xf32>
    %6 = arith.addf %3, %5 : vector<2x256xf32>
    %cst_5 = arith.constant 0.000000e+00 : f32
    %7 = vector.broadcast %cst_5 : f32 to vector<2x256xf32>
    %8 = arith.maximumf %6, %7 : vector<2x256xf32>
    %9 = arith.truncf %8 : vector<2x256xf32> to vector<2x256xbf16>
    %c0_6 = arith.constant 0 : index
    %c0_7 = arith.constant 0 : index
    %10 = vector.load %arg4[%c0_6, %c0_7] : memref<256x256xbf16, #tpu.memory_space<vmem>>, vector<256x256xbf16>
    %cst_8 = arith.constant dense<0.000000e+00> : vector<2x256xf32>
    %11 = tpu.matmul %9, %10, %cst_8 {dimension_numbers = #tpu.dot_dimension_numbers<[1], [0], [0], [1], [0, 0, 1, 1], [], []>} : vector<2x256xbf16>, vector<256x256xbf16>, vector<2x256xf32> -> vector<2x256xf32>
    %c0_9 = arith.constant 0 : index
    %c0_10 = arith.constant 0 : index
    %12 = vector.load %arg5[%c0_9, %c0_10] : memref<1x256xf32, #tpu.memory_space<vmem>>, vector<1x256xf32>
    %13 = vector.broadcast %12 : vector<1x256xf32> to vector<2x256xf32>
    %14 = arith.addf %11, %13 : vector<2x256xf32>
    %cst_11 = arith.constant 0.000000e+00 : f32
    %15 = vector.broadcast %cst_11 : f32 to vector<2x256xf32>
    %16 = arith.maximumf %14, %15 : vector<2x256xf32>
    %17 = arith.truncf %16 : vector<2x256xf32> to vector<2x256xbf16>
    %c0_12 = arith.constant 0 : index
    %c0_13 = arith.constant 0 : index
    %18 = vector.load %arg6[%c0_12, %c0_13] : memref<256x256xbf16, #tpu.memory_space<vmem>>, vector<256x256xbf16>
    %cst_14 = arith.constant dense<0.000000e+00> : vector<2x256xf32>
    %19 = tpu.matmul %17, %18, %cst_14 {dimension_numbers = #tpu.dot_dimension_numbers<[1], [0], [0], [1], [0, 0, 1, 1], [], []>} : vector<2x256xbf16>, vector<256x256xbf16>, vector<2x256xf32> -> vector<2x256xf32>
    %c0_15 = arith.constant 0 : index
    %c0_16 = arith.constant 0 : index
    %20 = vector.load %arg7[%c0_15, %c0_16] : memref<1x256xf32, #tpu.memory_space<vmem>>, vector<1x256xf32>
    %21 = vector.broadcast %20 : vector<1x256xf32> to vector<2x256xf32>
    %22 = arith.addf %19, %21 : vector<2x256xf32>
    %23 = vector.extract_strided_slice %22 {offsets = [0, 0], sizes = [2, 4], strides = [1, 1]} : vector<2x256xf32> to vector<2x4xf32>
    %c0_17 = arith.constant 0 : index
    %c0_18 = arith.constant 0 : index
    %24 = vector.load %arg8[%c0_17, %c0_18] : memref<2x4xf32, #tpu.memory_space<vmem>>, vector<2x4xf32>
    tpu.vector_store %arg8[%c0_17, %c0_18], %23 {strides = array<i32>} : memref<2x4xf32, #tpu.memory_space<vmem>>, vector<2x4xf32>,
    %25 = vector.extract_strided_slice %22 {offsets = [0, 128], sizes = [2, 4], strides = [1, 1]} : vector<2x256xf32> to vector<2x4xf32>
    %cst_19 = arith.constant -2.000000e+01 : f32
    %cst_20 = arith.constant 2.000000e+00 : f32
    %26 = vector.broadcast %cst_19 : f32 to vector<2x4xf32>
    %27 = arith.maximumf %26, %25 : vector<2x4xf32>
    %28 = vector.broadcast %cst_20 : f32 to vector<2x4xf32>
    %29 = arith.minimumf %28, %27 : vector<2x4xf32>
    %c0_21 = arith.constant 0 : index
    %c0_22 = arith.constant 0 : index
    %30 = vector.load %arg9[%c0_21, %c0_22] : memref<2x4xf32, #tpu.memory_space<vmem>>, vector<2x4xf32>
    tpu.vector_store %arg9[%c0_21, %c0_22], %29 {strides = array<i32>} : memref<2x4xf32, #tpu.memory_space<vmem>>, vector<2x4xf32>,
    return
  }
  func.func @transform_0(%arg0: i32) -> (i32, i32) {
    %c0_i32 = arith.constant 0 : i32
    %c0_i32_0 = arith.constant 0 : i32
    return %arg0, %c0_i32 : i32, i32
  }
  func.func @transform_1(%arg0: i32) -> (i32, i32) {
    %c0_i32 = arith.constant 0 : i32
    %c0_i32_0 = arith.constant 0 : i32
    %c0_i32_1 = arith.constant 0 : i32
    return %c0_i32, %c0_i32_0 : i32, i32
  }
  func.func @transform_2(%arg0: i32) -> (i32, i32) {
    %c0_i32 = arith.constant 0 : i32
    %c0_i32_0 = arith.constant 0 : i32
    %c0_i32_1 = arith.constant 0 : i32
    return %c0_i32, %c0_i32_0 : i32, i32
  }
  func.func @transform_3(%arg0: i32) -> (i32, i32) {
    %c0_i32 = arith.constant 0 : i32
    %c0_i32_0 = arith.constant 0 : i32
    %c0_i32_1 = arith.constant 0 : i32
    return %c0_i32, %c0_i32_0 : i32, i32
  }
  func.func @transform_4(%arg0: i32) -> (i32, i32) {
    %c0_i32 = arith.constant 0 : i32
    %c0_i32_0 = arith.constant 0 : i32
    %c0_i32_1 = arith.constant 0 : i32
    return %c0_i32, %c0_i32_0 : i32, i32
  }
  func.func @transform_5(%arg0: i32) -> (i32, i32) {
    %c0_i32 = arith.constant 0 : i32
    %c0_i32_0 = arith.constant 0 : i32
    %c0_i32_1 = arith.constant 0 : i32
    return %c0_i32, %c0_i32_0 : i32, i32
  }
  func.func @transform_6(%arg0: i32) -> (i32, i32) {
    %c0_i32 = arith.constant 0 : i32
    %c0_i32_0 = arith.constant 0 : i32
    %c0_i32_1 = arith.constant 0 : i32
    return %c0_i32, %c0_i32_0 : i32, i32
  }
  func.func @transform_7(%arg0: i32) -> (i32, i32) {
    %c0_i32 = arith.constant 0 : i32
    %c0_i32_0 = arith.constant 0 : i32
    return %arg0, %c0_i32 : i32, i32
  }
  func.func @transform_8(%arg0: i32) -> (i32, i32) {
    %c0_i32 = arith.constant 0 : i32
    %c0_i32_0 = arith.constant 0 : i32
    return %arg0, %c0_i32 : i32, i32
  }
}

</mosaic_0001>

<bundles_post_ra>
// kernel: policy_net_forward.1
= control target key start
LH: loop header
LB: loop body
LE: loop exit
PB: predicated region body
PF: predicated region fallthrough
CT: control target
= control target key end

     0   :  { %14 = vsyncpa [#allocation3], 0  ;;  %s1152_s0 = inlined_call_operand.hbm [shape: f32[2,16], index: 0, kind: input, shape index: {}]   ;;  %s1153_s1 = inlined_call_operand.hbm [shape: bf16[16,256], index: 1, kind: input, shape index: {}]   ;;  %s1154_s2 = inlined_call_operand.vmem [shape: f32[1,256], index: 2, kind: input, shape index: {}]   ;;  %s1155_s3 = inlined_call_operand.hbm [shape: bf16[256,256], index: 3, kind: input, shape index: {}]   ;;  %s1156_s4 = inlined_call_operand.vmem [shape: f32[1,256], index: 4, kind: input, shape index: {}]   ;;  %s1157_s5 = inlined_call_operand.hbm [shape: bf16[256,256], index: 5, kind: input, shape index: {}]   ;;  %s1158_s6 = inlined_call_operand.vmem [shape: f32[1,256], index: 6, kind: input, shape index: {}]   ;;  %s1159_s7 = inlined_call_operand.hbm [shape: f32[2,4], index: 7, kind: output, shape index: {0}]   ;;  %s1160_s8 = inlined_call_operand.hbm [shape: f32[2,4], index: 8, kind: output, shape index: {1}]  }
   0x1   :  { %15 = vsyncpa [#allocation6], 0 }
   0x2   :  { %16 = vsyncpa [#allocation9], 0 }
   0x3   :  { %17 = vsyncpa [#allocation4], 0 }
   0x4   :  { %18 = vsyncpa [#allocation12], 0  ;;  %s1006_s27 = smov [#allocation5]   ;;  %s864_s9 = scalar_lea.hbm %s1153_s1, 256 }
   0x5   :  { %s34_s28 = sshll.u32 %s1006_s27, 4  ;;  %p865_p0 = scmp.ne.s32.totalorder %s1153_s1, %s864_s9  ;;  %s35_s28 = int_to_ptr.vmem [resolvable:$true] %s34_s28 }
   0x6   :  { %p868_p1 = scmp.lt.u32.totalorder %s864_s9, %s1153_s1 }
   0x8   :  { %p870_p2 = pnand %p868_p1, %p865_p0 }
   0xa   :  { %873 = shalt.err (!%p870_p2)
}
   0xb   :  { %s874_s14 = scalar_lea.vmem %s35_s28, 256  ;;  %p879_p4 = scmp.lt.s32.totalorder %s35_s28, %s35_s28 }
   0xc   :  { %p875_p3 = scmp.ne.s32.totalorder %s35_s28, %s874_s14  ;;  %p880_p5 = scmp.lt.s32.totalorder %s874_s14, %s874_s14 }
   0xe   :  { %p881_p6 = por %p880_p5, %p879_p4 }
  0x10   :  { %p882_p7 = pnand %p881_p6, %p875_p3 }
  0x12   :  { %885 = shalt.err (!%p882_p7)
}
  0x13   :  { %s1007_s15 = smov 128   ;;  %s1008_s16 = smov 8  }
  0x14   :  { %40 = dma.hbm_to_vmem [thread:$0]  %s1153_s1, 256, %s35_s28, [#allocation6], %s1007_s15, %s1007_s15, %s1008_s16  }
  0x15   :  { %s1009_s19 = smov [#allocation2]   ;;  %s1010_s21 = smov [#allocation7]  }
  0x16   :  { %s25_s20 = sshll.u32 %s1009_s19, 4  ;;  %s48_s22 = sshll.u32 %s1010_s21, 4  ;;  %s26_s20 = int_to_ptr.vmem [resolvable:$true] %s25_s20  ;;  %s49_s22 = int_to_ptr.vmem [resolvable:$true] %s48_s22 }
  0x17   :  { %s886_s25 = scalar_lea.hbm %s1152_s0, 32 }
  0x18   :  { %p887_p8 = scmp.ne.s32.totalorder %s1152_s0, %s886_s25  ;;  %p890_p9 = scmp.lt.u32.totalorder %s886_s25, %s1152_s0 }
  0x1a   :  { %p892_p10 = pnand %p890_p9, %p887_p8 }
  0x1c   :  { %895 = shalt.err (!%p892_p10)
}
  0x1d   :  { %s896_s1 = scalar_lea.vmem %s26_s20, 32  ;;  %p901_p12 = scmp.lt.s32.totalorder %s26_s20, %s26_s20 }
  0x1e   :  { %p897_p11 = scmp.ne.s32.totalorder %s26_s20, %s896_s1  ;;  %p902_p13 = scmp.lt.s32.totalorder %s896_s1, %s896_s1 }
  0x20   :  { %p903_p0 = por %p902_p13, %p901_p12 }
  0x22   :  { %p904_p1 = pnand %p903_p0, %p897_p11 }
  0x24   :  { %907 = shalt.err (!%p904_p1)
}
  0x25   :  { %28 = dma.hbm_to_vmem [thread:$0]  %s1152_s0, 32, %s26_s20, [#allocation3]  }
  0x26   :  { %s908_s12 = scalar_lea.hbm %s1155_s3, 4096 }
  0x27   :  { %p909_p2 = scmp.ne.s32.totalorder %s1155_s3, %s908_s12  ;;  %p912_p3 = scmp.lt.u32.totalorder %s908_s12, %s1155_s3 }
  0x29   :  { %p914_p4 = pnand %p912_p3, %p909_p2 }
  0x2b   :  { %917 = shalt.err (!%p914_p4)
}
  0x2c   :  { %s918_s19 = scalar_lea.vmem %s49_s22, 4096  ;;  %p923_p6 = scmp.lt.s32.totalorder %s49_s22, %s49_s22 }
  0x2d   :  { %p919_p5 = scmp.ne.s32.totalorder %s49_s22, %s918_s19  ;;  %p924_p7 = scmp.lt.s32.totalorder %s918_s19, %s918_s19 }
  0x2f   :  { %p925_p8 = por %p924_p7, %p923_p6 }
  0x31   :  { %p926_p9 = pnand %p925_p8, %p919_p5 }
  0x33   :  { %929 = shalt.err (!%p926_p9)
}
  0x34   :  { %54 = dma.hbm_to_vmem [thread:$0]  %s1155_s3, 4096, %s49_s22, [#allocation6], %s1007_s15, %s1007_s15, %s1008_s16  }
  0x35   :  { %s1011_s21 = smov [#allocation8]   ;;  %s930_s26 = scalar_lea.hbm %s1157_s5, 4096 }
  0x36   :  { %s62_s23 = sshll.u32 %s1011_s21, 4  ;;  %p931_p10 = scmp.ne.s32.totalorder %s1157_s5, %s930_s26  ;;  %s63_s23 = int_to_ptr.vmem [resolvable:$true] %s62_s23 }
  0x37   :  { %p934_p11 = scmp.lt.u32.totalorder %s930_s26, %s1157_s5 }
  0x39   :  { %p936_p12 = pnand %p934_p11, %p931_p10 }
  0x3b   :  { %939 = shalt.err (!%p936_p12)
}
  0x3c   :  { %s940_s28 = scalar_lea.vmem %s63_s23, 4096  ;;  %p945_p0 = scmp.lt.s32.totalorder %s63_s23, %s63_s23 }
  0x3d   :  { %p941_p13 = scmp.ne.s32.totalorder %s63_s23, %s940_s28  ;;  %p946_p1 = scmp.lt.s32.totalorder %s940_s28, %s940_s28 }
  0x3f   :  { %p947_p2 = por %p946_p1, %p945_p0 }
  0x41   :  { %p948_p3 = pnand %p947_p2, %p941_p13 }
  0x43   :  { %951 = shalt.err (!%p948_p3)
}
  0x44   :  { %68 = dma.hbm_to_vmem [thread:$0]  %s1157_s5, 4096, %s63_s23, [#allocation9], %s1007_s15, %s1007_s15, %s1008_s16  }
  0x45   :  { %996 = dma.done.wait [#allocation3], 32  }
  0x46   :  { %997 = vsyncadd [#allocation3], 4294967264 }
  0x47   :  { %998 = dma.done.wait [#allocation6], 4352  }
  0x48   :  { %999 = vsyncadd [#allocation6], 4294962944 }
  0x49   :  { %1000 = dma.done.wait [#allocation9], 4096  }
  0x4a   :  { %1001 = vsyncadd [#allocation9], 4294963200  ;;  %v1012_v0 = vmov 0   ;;  %v765_v1 = vld [vmem:[#allocation5 + $0x4] ss:$8 sps:$4 sm:$0xff]   ;;  %vm110_vm0 = vcmask 130048  }
  0x4b   :  { %146 = vmatprep.mubr.bf16.mxu0 %v1012_v0  ;;  %v767_v2 = vld [vmem:[#allocation5] ss:$8 sps:$4 sm:$0xff]   ;;  %v84_v3 = vld [vmem:[#allocation2] sm:$0x3]  ;;  %114 = vmatprep.subr.bf16.mxu0 %v765_v1  ;;  %v770_v6 = vld [vmem:[#allocation7] ss:$8 sps:$4 sm:$0xff]   ;;  %v90_v1 = vlaneseq }
  0x4c   :  { %v85_v4 = vpack.c.bf16 %v84_v3, %v84_v3  ;;  %v768_v5 = vld [vmem:[#allocation7 + $0x4] ss:$8 sps:$4 sm:$0xff]   ;;  %115 = vmatpush1.bf16.msra.mxu0 %v767_v2  ;;  %v771_v7 = vld [vmem:[#allocation7 + $0x14] ss:$8 sps:$4 sm:$0xff]   ;;  %v773_v8 = vld [vmem:[#allocation7 + $0x10] ss:$8 sps:$4 sm:$0xff]  }
  0x4d   :  { %363 = vmatprep.subr.bf16.mxu1 %v768_v5  ;;  %v774_v9 = vld [vmem:[#allocation7 + $0x24] ss:$8 sps:$4 sm:$0xff]   ;;  %v776_v10 = vld [vmem:[#allocation7 + $0x20] ss:$8 sps:$4 sm:$0xff]   ;;  %v777_v11 = vld [vmem:[#allocation7 + $0x34] ss:$8 sps:$4 sm:$0xff]  }
  0x4e   :  { %364 = vmatpush1.bf16.msra.mxu1 %v770_v6  ;;  %v779_v12 = vld [vmem:[#allocation7 + $0x30] ss:$8 sps:$4 sm:$0xff]   ;;  %v780_v13 = vld [vmem:[#allocation7 + $0x44] ss:$8 sps:$4 sm:$0xff]   ;;  %v782_v14 = vld [vmem:[#allocation7 + $0x40] ss:$8 sps:$4 sm:$0xff]  }
  0x4f   :  { %691 = vmatmul.mubr.msk.bf16.vlgmr.msra.gmra.mrb[0].mxu0 %vm110_vm0, %v85_v4  ;;  %365 = vmatprep.subr.bf16.mxu1 %v771_v7  ;;  %v783_v15 = vld [vmem:[#allocation7 + $0x54] ss:$8 sps:$4 sm:$0xff]   ;;  %v785_v16 = vld [vmem:[#allocation7 + $0x50] ss:$8 sps:$4 sm:$0xff]   ;;  %v786_v17 = vld [vmem:[#allocation7 + $0x64] ss:$8 sps:$4 sm:$0xff]  }
  0x50   :  { %v788_v18 = vld [vmem:[#allocation7 + $0x60] ss:$8 sps:$4 sm:$0xff]   ;;  %v789_v19 = vld [vmem:[#allocation7 + $0x74] ss:$8 sps:$4 sm:$0xff]   ;;  %v791_v20 = vld [vmem:[#allocation7 + $0x70] ss:$8 sps:$4 sm:$0xff]  }
  0x51   :  { %v792_v21 = vld [vmem:[#allocation7 + $0x84] ss:$8 sps:$4 sm:$0xff]   ;;  %v794_v22 = vld [vmem:[#allocation7 + $0x80] ss:$8 sps:$4 sm:$0xff]   ;;  %v795_v23 = vld [vmem:[#allocation7 + $0x94] ss:$8 sps:$4 sm:$0xff]  }
  0x52   :  { %366 = vmatpush1.bf16.msra.mxu1 %v773_v8  ;;  %v797_v24 = vld [vmem:[#allocation7 + $0x90] ss:$8 sps:$4 sm:$0xff]   ;;  %v798_v25 = vld [vmem:[#allocation7 + $0xa4] ss:$8 sps:$4 sm:$0xff]   ;;  %v800_v26 = vld [vmem:[#allocation7 + $0xa0] ss:$8 sps:$4 sm:$0xff]  }
  0x53   :  { %367 = vmatprep.subr.bf16.mxu1 %v774_v9  ;;  %v801_v27 = vld [vmem:[#allocation7 + $0xb4] ss:$8 sps:$4 sm:$0xff]   ;;  %v803_v28 = vld [vmem:[#allocation7 + $0xb0] ss:$8 sps:$4 sm:$0xff]   ;;  %v804_v29 = vld [vmem:[#allocation7 + $0xc4] ss:$8 sps:$4 sm:$0xff]  }
  0x54   :  { %v806_v30 = vld [vmem:[#allocation7 + $0xc0] ss:$8 sps:$4 sm:$0xff]   ;;  %v807_v31 = vld [vmem:[#allocation7 + $0xd4] ss:$8 sps:$4 sm:$0xff]   ;;  %v809_v32 = vld [vmem:[#allocation7 + $0xd0] ss:$8 sps:$4 sm:$0xff]  }
  0x55   :  { %v810_v33 = vld [vmem:[#allocation7 + $0xe4] ss:$8 sps:$4 sm:$0xff]   ;;  %v812_v34 = vld [vmem:[#allocation7 + $0xe0] ss:$8 sps:$4 sm:$0xff]   ;;  %v813_v35 = vld [vmem:[#allocation7 + $0xf4] ss:$8 sps:$4 sm:$0xff]  }
  0x56   :  { %368 = vmatpush1.bf16.msra.mxu1 %v776_v10  ;;  %v815_v36 = vld [vmem:[#allocation7 + $0xf0] ss:$8 sps:$4 sm:$0xff]   ;;  %v816_v37 = vld [vmem:[#allocation8] ss:$8 sps:$4 sm:$0xff]   ;;  %v818_v38 = vld [vmem:[#allocation8 + $0x4] ss:$8 sps:$4 sm:$0xff]  }
  0x57   :  { %369 = vmatprep.subr.bf16.mxu1 %v777_v11  ;;  %v821_v39 = vld [vmem:[#allocation8 + $0x14] ss:$8 sps:$4 sm:$0xff]   ;;  %612 = vmatprep.subr.bf16.mxu0 %v818_v38  ;;  %v819_v40 = vld [vmem:[#allocation8 + $0x10] ss:$8 sps:$4 sm:$0xff]   ;;  %v824_v41 = vld [vmem:[#allocation8 + $0x24] ss:$8 sps:$4 sm:$0xff]  }
  0x58   :  { %613 = vmatpush1.bf16.msra.mxu0 %v816_v37  ;;  %v822_v42 = vld [vmem:[#allocation8 + $0x20] ss:$8 sps:$4 sm:$0xff]   ;;  %v827_v43 = vld [vmem:[#allocation8 + $0x34] ss:$8 sps:$4 sm:$0xff]   ;;  %v825_v44 = vld [vmem:[#allocation8 + $0x30] ss:$8 sps:$4 sm:$0xff]  }
  0x59   :  { %614 = vmatprep.subr.bf16.mxu0 %v821_v39  ;;  %v830_v45 = vld [vmem:[#allocation8 + $0x44] ss:$8 sps:$4 sm:$0xff]   ;;  %v828_v46 = vld [vmem:[#allocation8 + $0x40] ss:$8 sps:$4 sm:$0xff]   ;;  %v833_v47 = vld [vmem:[#allocation8 + $0x54] ss:$8 sps:$4 sm:$0xff]  }
  0x5a   :  { %370 = vmatpush1.bf16.msra.mxu1 %v779_v12  ;;  %v831_v48 = vld [vmem:[#allocation8 + $0x50] ss:$8 sps:$4 sm:$0xff]   ;;  %v836_v49 = vld [vmem:[#allocation8 + $0x64] ss:$8 sps:$4 sm:$0xff]   ;;  %v834_v50 = vld [vmem:[#allocation8 + $0x60] ss:$8 sps:$4 sm:$0xff]  }
  0x5b   :  { %371 = vmatprep.subr.bf16.mxu1 %v780_v13  ;;  %v839_v51 = vld [vmem:[#allocation8 + $0x74] ss:$8 sps:$4 sm:$0xff]   ;;  %v837_v52 = vld [vmem:[#allocation8 + $0x70] ss:$8 sps:$4 sm:$0xff]   ;;  %v842_v53 = vld [vmem:[#allocation8 + $0x84] ss:$8 sps:$4 sm:$0xff]  }
  0x5c   :  { %615 = vmatpush1.bf16.msra.mxu0 %v819_v40  ;;  %v840_v54 = vld [vmem:[#allocation8 + $0x80] ss:$8 sps:$4 sm:$0xff]   ;;  %v845_v55 = vld [vmem:[#allocation8 + $0x94] ss:$8 sps:$4 sm:$0xff]   ;;  %v843_v56 = vld [vmem:[#allocation8 + $0x90] ss:$8 sps:$4 sm:$0xff]  }
  0x5d   :  { %616 = vmatprep.subr.bf16.mxu0 %v824_v41  ;;  %v848_v57 = vld [vmem:[#allocation8 + $0xa4] ss:$8 sps:$4 sm:$0xff]   ;;  %v846_v58 = vld [vmem:[#allocation8 + $0xa0] ss:$8 sps:$4 sm:$0xff]   ;;  %v851_v59 = vld [vmem:[#allocation8 + $0xb4] ss:$8 sps:$4 sm:$0xff]  }
  0x5e   :  { %372 = vmatpush1.bf16.msra.mxu1 %v782_v14  ;;  %v849_v60 = vld [vmem:[#allocation8 + $0xb0] ss:$8 sps:$4 sm:$0xff]   ;;  %v854_v61 = vld [vmem:[#allocation8 + $0xc4] ss:$8 sps:$4 sm:$0xff]   ;;  %v852_v62 = vld [vmem:[#allocation8 + $0xc0] ss:$8 sps:$4 sm:$0xff]  }
  0x5f   :  { %373 = vmatprep.subr.bf16.mxu1 %v783_v15  ;;  %v857_v63 = vld [vmem:[#allocation8 + $0xd4] ss:$8 sps:$4 sm:$0xff]   ;;  %v855_v0 = vld [vmem:[#allocation8 + $0xd0] ss:$8 sps:$4 sm:$0xff]   ;;  %v91_v2 = vshrl.u32 %v90_v1, 7  ;;  %vm653_vm1 = vcmask 25600  }
  0x60   :  { %617 = vmatpush1.bf16.msra.mxu0 %v822_v42  ;;  %v88_v4 = vld [vmem:[%s1154_s2] sm:$0x3]  ;;  %s1014_s12 = smov [#allocation11]  }
  0x61   :  { %618 = vmatprep.subr.bf16.mxu0 %v827_v43  ;;  %v92_v3 = vsub.s32 0, %v91_v2  ;;  %v96_v5 = vsub.s32 1, %v91_v2  ;;  %s674_s13 = sshll.u32 %s1014_s12, 4  ;;  %s675_s13 = int_to_ptr.vmem [resolvable:$true] %s674_s13 }
  0x62   :  { %374 = vmatpush1.bf16.msra.mxu1 %v785_v16 }
  0x63   :  { %375 = vmatprep.subr.bf16.mxu1 %v786_v17  ;;  %v93_v6 = vrot.slane %v88_v4, %v92_v3  ;;  %v97_v7 = vrot.slane %v88_v4, %v96_v5 }
  0x64   :  { %619 = vmatpush1.bf16.msra.mxu0 %v825_v44 }
  0x65   :  { %620 = vmatprep.subr.bf16.mxu0 %v830_v45 }
  0x66   :  { %376 = vmatpush1.bf16.msra.mxu1 %v788_v18  ;;  %v860_v18 = vld [vmem:[#allocation8 + $0xe4] ss:$8 sps:$4 sm:$0xff]  }
  0x67   :  { %377 = vmatprep.subr.bf16.mxu1 %v789_v19  ;;  %v858_v19 = vld [vmem:[#allocation8 + $0xe0] ss:$8 sps:$4 sm:$0xff]  }
  0x68   :  { %621 = vmatpush1.bf16.msra.mxu0 %v828_v46 }
  0x69   :  { %622 = vmatprep.subr.bf16.mxu0 %v833_v47 }
  0x6a   :  { %378 = vmatpush1.bf16.msra.mxu1 %v791_v20  ;;  %v863_v20 = vld [vmem:[#allocation8 + $0xf4] ss:$8 sps:$4 sm:$0xff]  }
  0x6b   :  { %379 = vmatprep.subr.bf16.mxu1 %v792_v21  ;;  %v861_v21 = vld [vmem:[#allocation8 + $0xf0] ss:$8 sps:$4 sm:$0xff]  }
  0x6c   :  { %623 = vmatpush1.bf16.msra.mxu0 %v831_v48 }
  0x6d   :  { %624 = vmatprep.subr.bf16.mxu0 %v836_v49 }
  0x6e   :  { %380 = vmatpush1.bf16.msra.mxu1 %v794_v22  ;;  %v191_v22 = vld [vmem:[%s1156_s4] sm:$0x3]  ;;  %s1013_s4 = smov [#allocation10]  }
  0x6f   :  { %381 = vmatprep.subr.bf16.mxu1 %v795_v23  ;;  %v196_v23 = vrot.slane %v191_v22, %v92_v3  ;;  %s664_s11 = sshll.u32 %s1013_s4, 4  ;;  %s665_s11 = int_to_ptr.vmem [resolvable:$true] %s664_s11 }
  0x70   :  { %625 = vmatpush1.bf16.msra.mxu0 %v834_v50  ;;  %s952_s14 = scalar_lea.vmem %s665_s11, 32  ;;  %p957_p5 = scmp.lt.s32.totalorder %s665_s11, %s665_s11 }
  0x71   :  { %626 = vmatprep.subr.bf16.mxu0 %v839_v51  ;;  %p953_p4 = scmp.ne.s32.totalorder %s665_s11, %s952_s14  ;;  %p958_p6 = scmp.lt.s32.totalorder %s952_s14, %s952_s14 }
  0x72   :  { %382 = vmatpush1.bf16.msra.mxu1 %v797_v24  ;;  %v200_v24 = vrot.slane %v191_v22, %v96_v5 }
  0x73   :  { %383 = vmatprep.subr.bf16.mxu1 %v798_v25  ;;  %p959_p7 = por %p958_p6, %p957_p5 }
  0x74   :  { %627 = vmatpush1.bf16.msra.mxu0 %v837_v52 }
  0x75   :  { %628 = vmatprep.subr.bf16.mxu0 %v842_v53  ;;  %p960_p8 = pnand %p959_p7, %p953_p4 }
  0x76   :  { %384 = vmatpush1.bf16.msra.mxu1 %v800_v26 }
  0x77   :  { %385 = vmatprep.subr.bf16.mxu1 %v801_v27 }
  0x78   :  { %629 = vmatpush1.bf16.msra.mxu0 %v840_v54 }
  0x79   :  { %630 = vmatprep.subr.bf16.mxu0 %v845_v55 }
  0x7a   :  { %386 = vmatpush1.bf16.msra.mxu1 %v803_v28 }
  0x7b   :  { %387 = vmatprep.subr.bf16.mxu1 %v804_v29 }
  0x7c   :  { %631 = vmatpush1.bf16.msra.mxu0 %v843_v56 }
  0x7d   :  { %632 = vmatprep.subr.bf16.mxu0 %v848_v57 }
  0x7e   :  { %388 = vmatpush1.bf16.msra.mxu1 %v806_v30 }
  0x7f   :  { %389 = vmatprep.subr.bf16.mxu1 %v807_v31 }
  0x80   :  { %633 = vmatpush1.bf16.msra.mxu0 %v846_v58 }
  0x81   :  { %634 = vmatprep.subr.bf16.mxu0 %v851_v59 }
  0x82   :  { %390 = vmatpush1.bf16.msra.mxu1 %v809_v32 }
  0x83   :  { %391 = vmatprep.subr.bf16.mxu1 %v810_v33 }
  0x84   :  { %635 = vmatpush1.bf16.msra.mxu0 %v849_v60 }
  0x85   :  { %636 = vmatprep.subr.bf16.mxu0 %v854_v61 }
  0x86   :  { %392 = vmatpush1.bf16.msra.mxu1 %v812_v34 }
  0x87   :  { %393 = vmatprep.subr.bf16.mxu1 %v813_v35  ;;  %v440_v35 = vld [vmem:[%s1158_s6] sm:$0x3] }
  0x88   :  { %637 = vmatpush1.bf16.msra.mxu0 %v852_v62  ;;  %v449_v37 = vrot.slane %v440_v35, %v96_v5 }
  0x89   :  { %638 = vmatprep.subr.bf16.mxu0 %v857_v63 }
  0x8a   :  { %394 = vmatpush1.bf16.msra.mxu1 %v815_v36  ;;  %v445_v36 = vrot.slane %v440_v35, %v92_v3 }
  0x8c   :  { %639 = vmatpush1.bf16.msra.mxu0 %v855_v0 }
  0x8d   :  { %640 = vmatprep.subr.bf16.mxu0 %v860_v18 }
  0x90   :  { %641 = vmatpush1.bf16.msra.mxu0 %v858_v19 }
  0x91   :  { %642 = vmatprep.subr.bf16.mxu0 %v863_v20 }
  0x94   :  { %643 = vmatpush1.bf16.msra.mxu0 %v861_v21 }
 0x122   :  { %v148_v8 = vpop.f32.mrb[0].mxu0 }
 0x123   :  { %v149_v9 = vadd.f32 %v148_v8, %v93_v6  ;;  %v150_v10 = vpop.f32.mrb[1].mxu0 }
 0x124   :  { %v151_v11 = vadd.f32 %v150_v10, %v97_v7  ;;  %v152_v12 = vpop.f32.mrb[2].mxu0 }
 0x125   :  { %v155_v13 = vmax.f32 %v149_v9, 0.0  ;;  %v153_v14 = vpop.f32.mrb[3].mxu0 }
 0x126   :  { %v156_v15 = vmax.f32 %v151_v11, 0.0 }
 0x127   :  { %v157_v17 = vpack.c.bf16 %v155_v13, %v155_v13 }
 0x128   :  { %v158_v16 = vpack.c.bf16 %v156_v15, %v156_v15 }
 0x12a   :  { %395 = vmatprep.mubr.bf16.mxu1 %v158_v16 }
 0x12b   :  { %396 = vmatmul.mubr.bf16.vlgmr.msra.gmra.mrb[0].mxu1 %v157_v17 }
 0x1fe   :  { %v397_v25 = vpop.f32.mrb[0].mxu1 }
 0x1ff   :  { %v398_v26 = vadd.f32 %v397_v25, %v196_v23  ;;  %v399_v27 = vpop.f32.mrb[1].mxu1 }
 0x200   :  { %v400_v28 = vadd.f32 %v399_v27, %v200_v24  ;;  %v401_v29 = vpop.f32.mrb[2].mxu1 }
 0x201   :  { %v404_v30 = vmax.f32 %v398_v26, 0.0  ;;  %v402_v31 = vpop.f32.mrb[3].mxu1 }
 0x202   :  { %v405_v32 = vmax.f32 %v400_v28, 0.0 }
 0x203   :  { %v406_v34 = vpack.c.bf16 %v404_v30, %v404_v30 }
 0x204   :  { %v407_v33 = vpack.c.bf16 %v405_v32, %v405_v32 }
 0x206   :  { %644 = vmatprep.mubr.bf16.mxu0 %v407_v33 }
 0x207   :  { %645 = vmatmul.mubr.bf16.vlgmr.msra.gmra.mrb[4].mxu0 %v406_v34 }
 0x2da   :  { %v646_v38 = vpop.f32.mrb[4].mxu0 }
 0x2db   :  { %v647_v39 = vadd.f32 %v646_v38, %v445_v36  ;;  %v648_v40 = vpop.f32.mrb[5].mxu0 }
 0x2dc   :  { %v649_v41 = vadd.f32 %v648_v40, %v449_v37  ;;  %v650_v42 = vpop.f32.mrb[6].mxu0 }
 0x2dd   :  { %v651_v43 = vpop.f32.mrb[7].mxu0  ;;  %654 = vst.msk [vmem:[#allocation10] sm:$0x3] %vm653_vm1, %v647_v39 }
 0x2de   :  { %v655_v44 = vmax.f32 %v649_v41, -20.0 }
 0x2df   :  { %963 = shalt.err (!%p960_p8)
}
 0x2e0   :  { %s964_s18 = scalar_lea.hbm %s1159_s7, 32 }
 0x2e1   :  { %p965_p9 = scmp.ne.s32.totalorder %s1159_s7, %s964_s18  ;;  %p968_p10 = scmp.lt.u32.totalorder %s964_s18, %s1159_s7 }
 0x2e3   :  { %p970_p11 = pnand %p968_p10, %p965_p9 }
 0x2e5   :  { %973 = shalt.err (!%p970_p11)
}
 0x2e6   :  { %667 = dma.vmem_to_hbm [thread:$0]  %s665_s11, 32, %s1159_s7, [#allocation4]   ;;  %v656_v45 = vmin.f32 %v655_v44, 2.0 }
 0x2e7   :  { %s974_s25 = scalar_lea.vmem %s675_s13, 32  ;;  %p979_p13 = scmp.lt.s32.totalorder %s675_s13, %s675_s13 }
 0x2e8   :  { %657 = vst.msk [vmem:[#allocation11] sm:$0x3] %vm653_vm1, %v656_v45  ;;  %p975_p12 = scmp.ne.s32.totalorder %s675_s13, %s974_s25  ;;  %p980_p0 = scmp.lt.s32.totalorder %s974_s25, %s974_s25 }
 0x2ea   :  { %p981_p1 = por %p980_p0, %p979_p13 }
 0x2ec   :  { %p982_p2 = pnand %p981_p1, %p975_p12 }
 0x2ee   :  { %985 = shalt.err (!%p982_p2)
}
 0x2ef   :  { %s986_s29 = scalar_lea.hbm %s1160_s8, 32 }
 0x2f0   :  { %p987_p3 = scmp.ne.s32.totalorder %s1160_s8, %s986_s29  ;;  %p990_p4 = scmp.lt.u32.totalorder %s986_s29, %s1160_s8 }
 0x2f2   :  { %p992_p5 = pnand %p990_p4, %p987_p3 }
 0x2f4   :  { %995 = shalt.err (!%p992_p5)
}
 0x2f5   :  { %677 = dma.vmem_to_hbm [thread:$0]  %s675_s13, 32, %s1160_s8, [#allocation12]  }
 0x2f6   :  { %1002 = dma.done.wait [#allocation4], 32  }
 0x2f7   :  { %1003 = vsyncadd [#allocation4], 4294967264 }
 0x2f8   :  { %1004 = dma.done.wait [#allocation12], 32  }
 0x2f9   :  { %1005 = vsyncadd [#allocation12], 4294967264 }
 0x2fa   :  { %684 = vsyncpa [#allocation3], 1 }
 0x2fb   :  { %685 = vsyncpa [#allocation6], 1 }
 0x2fc   :  { %686 = vsyncpa [#allocation9], 1 }
 0x2fd   :  { %687 = vsyncpa [#allocation4], 1 }
 0x2fe   :  { %688 = vsyncpa [#allocation12], 1 }

</bundles_post_ra>
